<compile_context>
chip_gen: v5e
topology: v5e:2x2
jax: 0.10.0
libtpu: 0.0.40
codegen_flags: <defaults>
</compile_context>

<pallas_src>
import jax
import jax.numpy as jnp
from jax.experimental import pallas as pl
from jax.experimental.pallas import tpu as pltpu


def _round_up(a, m):
    return ((a + m - 1) // m) * m


def _choose_tk(f_in, tk_max=2048):
    """K tile for fc1. Must divide F_in exactly: the K axis is a reduction, so
    a partial (OOB-garbage) block would pollute the accumulator."""
    if f_in <= tk_max:
        return f_in
    for tk in range(tk_max - tk_max % 128, 127, -128):
        if f_in % tk == 0:
            return tk
    # TODO(synk): pad x/w1 along K when F_in has no 128-multiple divisor <= tk_max.
    return f_in


def finetune_block1_kernel(
    x_ref,      # (TM, TK)     bf16
    w1_ref,     # (TK, 512)    bf16
    b1_ref,     # (1, 512)     fp32
    w2_ref,     # (512, 128)   bf16  (bn1 folded in)
    b2_ref,     # (1, 128)     fp32  (bn1 folded in)
    w3_ref,     # (128, Npad)  bf16  (bn2 folded in, zero-padded head)
    b3_ref,     # (1, Npad)    fp32  (bn2 folded in, zero-padded head)
    out_ref,    # (TM, Npad)   bf16
    acc_ref,    # (TM, 512)    fp32  scratch: fc1 K-reduction accumulator
):
    k = pl.program_id(1)

    @pl.when(k == 0)
    def _init():
        acc_ref[...] = jnp.zeros_like(acc_ref)

    # fc1 partial product over this K tile (fp32 accumulation on the MXU).
    acc_ref[...] += jnp.dot(x_ref[...], w1_ref[...],
                            preferred_element_type=jnp.float32)

    @pl.when(k == pl.num_programs(1) - 1)
    def _finalize():
        # fc1 bias + ReLU   (Dropout == identity in eval; bn1 folded into w2/b2)
        h1 = jnp.maximum(acc_ref[...] + b1_ref[...], 0.0)
        # (bn1-folded) fc2 + ReLU   (bn2 folded into w3/b3)
        h2 = jnp.dot(h1.astype(jnp.bfloat16), w2_ref[...],
                     preferred_element_type=jnp.float32)
        h2 = jnp.maximum(h2 + b2_ref[...], 0.0)
        # (bn2-folded) fc3, lane-dense padded head
        out = jnp.dot(h2.astype(jnp.bfloat16), w3_ref[...],
                      preferred_element_type=jnp.float32) + b3_ref[...]
        out_ref[...] = out.astype(out_ref.dtype)


def finetune_block1_forward(x, kparams, n_classes, *, tm=1024, tk_max=2048,
                            out_dtype=jnp.bfloat16, trim=True):
    """x: (B, F_in) float32 or bfloat16.  kparams: folded/padded params."""
    B, F_in = x.shape
    if x.dtype != jnp.bfloat16:
        # Ideally the producer already emits bf16; cast once here otherwise.
        x = x.astype(jnp.bfloat16)

    w1, b1 = kparams["w1"], kparams["b1"]
    w2, b2 = kparams["w2"], kparams["b2"]
    w3, b3 = kparams["w3"], kparams["b3"]
    n_pad = w3.shape[1]                      # lane-dense padded head width

    # --- batch tiling: big tiles to amortize ~0.35us/step, but always >= 2
    # grid steps so the "parallel" axis shards across v7x's 2 TensorCores.
    if B <= 8:
        TM = B                               # single tiny block (== full dim)
    else:
        TM = min(tm, _round_up(-(-B // 2), 8))
    nm = -(-B // TM)                         # cdiv; partial last block is OK

    # --- K tiling for fc1 (exact divisor of F_in; 1 step at small F_in).
    TK = _choose_tk(F_in, tk_max)
    nk = F_in // TK

    single = pl.Buffered(1)                  # constant blocks: no double buffer

    def resident(a):
        nd = a.ndim
        return pl.BlockSpec(a.shape, lambda i, k, _nd=nd: (0,) * _nd,
                            pipeline_mode=single)

    w1_spec = (resident(w1) if nk == 1
               else pl.BlockSpec((TK, 512), lambda i, k: (k, 0)))

    # --- scoped VMEM: raise above v5e's 16 MiB default when TM/F_in grow,
    # never below the 32 MiB v6e/v7x default, capped under v7x physical 64 MiB.
    out_isz = jnp.dtype(out_dtype).itemsize
    est = (2 * TM * TK * 2                              # x (bf16, 2-buf)
           + (1 if nk == 1 else 2) * TK * 512 * 2       # w1 (bf16)
           + (w2.size + w3.size) * 2                    # resident bf16 weights
           + (b1.size + b2.size + b3.size) * 4          # resident fp32 biases
           + 2 * TM * n_pad * out_isz                   # out (2-buf)
           + TM * 512 * 4)                              # fp32 accumulator
    vmem_limit = min(max(2 * est + (8 << 20), 32 << 20), 56 << 20)

    flops = 2 * B * (F_in * 512 + 512 * 128 + 128 * n_pad)
    bytes_accessed = int(B * F_in * 2
                         + sum(a.size * a.dtype.itemsize
                               for a in (w1, b1, w2, b2, w3, b3))
                         + B * n_pad * out_isz)

    out = pl.pallas_call(
        finetune_block1_kernel,
        out_shape=jax.ShapeDtypeStruct((B, n_pad), out_dtype),
        grid_spec=pltpu.PrefetchScalarGridSpec(
            num_scalar_prefetch=0,
            grid=(nm, nk),                   # batch outer, K-reduction last
            in_specs=[
                pl.BlockSpec((TM, TK), lambda i, k: (i, k)),   # x
                w1_spec,
                resident(b1),
                resident(w2), resident(b2),
                resident(w3), resident(b3),
            ],
            out_specs=pl.BlockSpec((TM, n_pad), lambda i, k: (i, 0)),
            scratch_shapes=[pltpu.VMEM((TM, 512), jnp.float32)],
        ),
        compiler_params=pltpu.CompilerParams(
            dimension_semantics=("parallel", "arbitrary"),
            vmem_limit_bytes=vmem_limit,
        ),
        cost_estimate=pl.CostEstimate(
            flops=flops, transcendentals=0, bytes_accessed=bytes_accessed),
    )(x, w1, b1, w2, b2, w3, b3)

    if not trim:
        return out          # padded (B, n_pad) slab: fuse slice into consumer
    return out[:, :n_classes]


def fold_params(p, n_classes, eps=1e-5):
    """Fold eval-mode BN into the *following* linear; pad head to 128 lanes."""
    s1 = p["g1"] * jax.lax.rsqrt(p["v1"] + eps)      # (1, 512)
    t1 = p["be1"] - p["m1"] * s1
    s2 = p["g2"] * jax.lax.rsqrt(p["v2"] + eps)      # (1, 128)
    t2 = p["be2"] - p["m2"] * s2

    w2f = p["w2"] * s1.T                             # row-scale (512, 128)
    b2f = t1 @ p["w2"] + p["b2"]                     # (1, 128)
    w3f = p["w3"] * s2.T                             # (128, n_classes)
    b3f = t2 @ p["w3"] + p["b3"]                     # (1, n_classes)

    n_pad = _round_up(max(n_classes, 1), 128)
    pad = n_pad - n_classes
    w3p = jnp.pad(w3f, ((0, 0), (0, pad)))
    b3p = jnp.pad(b3f, ((0, 0), (0, pad)))

    return dict(
        w1=p["w1"].astype(jnp.bfloat16), b1=p["b1"],
        w2=w2f.astype(jnp.bfloat16),     b2=b2f,
        w3=w3p.astype(jnp.bfloat16),     b3=b3p,
    )


def init_params(key, input_size, n_classes):
    """Deterministic synthetic parameters matching FineTuneBlock1.__init__."""
    ks = jax.random.split(key, 14)

    def lin(kw, kb, fan_in, fan_out):
        bound = 1.0 / jnp.sqrt(fan_in)
        w = jax.random.uniform(kw, (fan_in, fan_out), jnp.float32, -bound, bound)
        b = jax.random.uniform(kb, (1, fan_out), jnp.float32, -bound, bound)
        return w, b

    w1, b1 = lin(ks[0], ks[1], input_size, 512)
    w2, b2 = lin(ks[2], ks[3], 512, 128)
    w3, b3 = lin(ks[4], ks[5], 128, n_classes)

    g1 = 1.0 + 0.1 * jax.random.normal(ks[6], (1, 512), jnp.float32)
    be1 = 0.1 * jax.random.normal(ks[7], (1, 512), jnp.float32)
    m1 = 0.05 * jax.random.normal(ks[8], (1, 512), jnp.float32)
    v1 = jnp.abs(1.0 + 0.1 * jax.random.normal(ks[9], (1, 512), jnp.float32))

    g2 = 1.0 + 0.1 * jax.random.normal(ks[10], (1, 128), jnp.float32)
    be2 = 0.1 * jax.random.normal(ks[11], (1, 128), jnp.float32)
    m2 = 0.05 * jax.random.normal(ks[12], (1, 128), jnp.float32)
    v2 = jnp.abs(1.0 + 0.1 * jax.random.normal(ks[13], (1, 128), jnp.float32))

    return dict(w1=w1, b1=b1, w2=w2, b2=b2, w3=w3, b3=b3,
                g1=g1, be1=be1, m1=m1, v1=v1,
                g2=g2, be2=be2, m2=m2, v2=v2)


def reference_forward(x, p, eps=1e-5):
    """Pure fp32 JAX reference of the eval-mode PyTorch forward (unfolded)."""
    h1 = jnp.maximum(x @ p["w1"] + p["b1"], 0.0)               # fc1 -> ReLU
    # Dropout == identity in eval
    h1 = (h1 - p["m1"]) * jax.lax.rsqrt(p["v1"] + eps) * p["g1"] + p["be1"]
    h2 = jnp.maximum(h1 @ p["w2"] + p["b2"], 0.0)              # fc2 -> ReLU
    h2 = (h2 - p["m2"]) * jax.lax.rsqrt(p["v2"] + eps) * p["g2"] + p["be2"]
    return h2 @ p["w3"] + p["b3"]                              # fc3


if __name__ == "__main__":
    B, INPUT_SIZE, N_CLASSES = 16, 32, 10

    key = jax.random.PRNGKey(0)
    k_x, k_p = jax.random.split(key)
    x = jax.random.normal(k_x, (B, INPUT_SIZE), jnp.float32)
    raw = init_params(k_p, INPUT_SIZE, N_CLASSES)
    kparams = fold_params(raw, N_CLASSES)

    # B=16 -> TM=8, grid=(2, 1): exercises the batch-tiled, megacore-shardable
    # grid; K axis degenerates to 1 step at F_in=32.
    out = finetune_block1_forward(x, kparams, N_CLASSES)
    out = jax.block_until_ready(out)

    ref = jax.block_until_ready(reference_forward(x, raw))
    assert out.shape == (B, N_CLASSES)
    out_f32 = out.astype(jnp.float32)
    # bf16 activations/weights/output -> loosened tolerance vs fp32 reference.
    assert jnp.allclose(out_f32, ref, atol=5e-2, rtol=5e-2), \
        float(jnp.max(jnp.abs(out_f32 - ref)))

    print("KERNEL_OK")
</pallas_src>

<mosaic_0001>
module attributes {stable_mosaic.version = 11 : i64} {
  func.func @finetune_block1_kernel(%arg0: i32, %arg1: i32, %arg2: memref<8x32xbf16, #tpu.memory_space<vmem>>, %arg3: memref<32x512xbf16, #tpu.memory_space<vmem>>, %arg4: memref<1x512xf32, #tpu.memory_space<vmem>>, %arg5: memref<512x128xbf16, #tpu.memory_space<vmem>>, %arg6: memref<1x128xf32, #tpu.memory_space<vmem>>, %arg7: memref<128x128xbf16, #tpu.memory_space<vmem>>, %arg8: memref<1x128xf32, #tpu.memory_space<vmem>>, %arg9: memref<8x128xbf16, #tpu.memory_space<vmem>>, %arg10: memref<8x512xf32, #tpu.memory_space<vmem>>) attributes {dimension_semantics = [#tpu.dimension_semantics<parallel>, #tpu.dimension_semantics<arbitrary>], iteration_bounds = array<i64: 2, 1>, scalar_prefetch = 0 : i64, scratch_operands = 1 : i64, tpu.core_type = #tpu.core_type<tc>, window_params = [{transform_indices = @transform_0, window_bounds = array<i64: 8, 32>}, {pipeline_mode = #tpu.pipeline_mode<synchronous>, transform_indices = @transform_1, window_bounds = array<i64: 32, 512>}, {pipeline_mode = #tpu.pipeline_mode<synchronous>, transform_indices = @transform_2, window_bounds = array<i64: 1, 512>}, {pipeline_mode = #tpu.pipeline_mode<synchronous>, transform_indices = @transform_3, window_bounds = array<i64: 512, 128>}, {pipeline_mode = #tpu.pipeline_mode<synchronous>, transform_indices = @transform_4, window_bounds = array<i64: 1, 128>}, {pipeline_mode = #tpu.pipeline_mode<synchronous>, transform_indices = @transform_5, window_bounds = array<i64: 128, 128>}, {pipeline_mode = #tpu.pipeline_mode<synchronous>, transform_indices = @transform_6, window_bounds = array<i64: 1, 128>}, {transform_indices = @transform_7, window_bounds = array<i64: 8, 128>}]} {
    %c0_i32 = arith.constant 0 : i32
    %0 = arith.cmpi eq, %arg1, %c0_i32 : i32
    %1 = arith.extui %0 : i1 to i32
    %c0_i32_0 = arith.constant 0 : i32
    %2 = arith.cmpi ne, %1, %c0_i32_0 : i32
    scf.if %2 {
      %cst_10 = arith.constant 0.000000e+00 : f32
      %12 = vector.broadcast %cst_10 : f32 to vector<8x512xf32>
      %c0_11 = arith.constant 0 : index
      %c0_12 = arith.constant 0 : index
      %13 = vector.load %arg10[%c0_11, %c0_12] : memref<8x512xf32, #tpu.memory_space<vmem>>, vector<8x512xf32>
      tpu.vector_store %arg10[%c0_11, %c0_12], %12 {strides = array<i32>} : memref<8x512xf32, #tpu.memory_space<vmem>>, vector<8x512xf32>,
    } else {
    }
    %c0 = arith.constant 0 : index
    %c0_1 = arith.constant 0 : index
    %3 = vector.load %arg10[%c0, %c0_1] : memref<8x512xf32, #tpu.memory_space<vmem>>, vector<8x512xf32>
    %c0_2 = arith.constant 0 : index
    %c0_3 = arith.constant 0 : index
    %4 = vector.load %arg2[%c0_2, %c0_3] : memref<8x32xbf16, #tpu.memory_space<vmem>>, vector<8x32xbf16>
    %c0_4 = arith.constant 0 : index
    %c0_5 = arith.constant 0 : index
    %5 = vector.load %arg3[%c0_4, %c0_5] : memref<32x512xbf16, #tpu.memory_space<vmem>>, vector<32x512xbf16>
    %cst = arith.constant dense<0.000000e+00> : vector<8x512xf32>
    %6 = tpu.matmul %4, %5, %cst {dimension_numbers = #tpu.dot_dimension_numbers<[1], [0], [0], [1], [0, 0, 1, 1], [], []>} : vector<8x32xbf16>, vector<32x512xbf16>, vector<8x512xf32> -> vector<8x512xf32>
    %7 = arith.addf %3, %6 : vector<8x512xf32>
    %c0_6 = arith.constant 0 : index
    %c0_7 = arith.constant 0 : index
    %8 = vector.load %arg10[%c0_6, %c0_7] : memref<8x512xf32, #tpu.memory_space<vmem>>, vector<8x512xf32>
    tpu.vector_store %arg10[%c0_6, %c0_7], %7 {strides = array<i32>} : memref<8x512xf32, #tpu.memory_space<vmem>>, vector<8x512xf32>,
    %c0_i32_8 = arith.constant 0 : i32
    %9 = arith.cmpi eq, %arg1, %c0_i32_8 : i32
    %10 = arith.extui %9 : i1 to i32
    %c0_i32_9 = arith.constant 0 : i32
    %11 = arith.cmpi ne, %10, %c0_i32_9 : i32
    scf.if %11 {
      %c0_10 = arith.constant 0 : index
      %c0_11 = arith.constant 0 : index
      %12 = vector.load %arg10[%c0_10, %c0_11] : memref<8x512xf32, #tpu.memory_space<vmem>>, vector<8x512xf32>
      %c0_12 = arith.constant 0 : index
      %c0_13 = arith.constant 0 : index
      %13 = vector.load %arg4[%c0_12, %c0_13] : memref<1x512xf32, #tpu.memory_space<vmem>>, vector<1x512xf32>
      %14 = vector.broadcast %13 : vector<1x512xf32> to vector<8x512xf32>
      %15 = arith.addf %12, %14 : vector<8x512xf32>
      %cst_14 = arith.constant 0.000000e+00 : f32
      %16 = vector.broadcast %cst_14 : f32 to vector<8x512xf32>
      %17 = arith.maximumf %15, %16 : vector<8x512xf32>
      %18 = arith.truncf %17 : vector<8x512xf32> to vector<8x512xbf16>
      %c0_15 = arith.constant 0 : index
      %c0_16 = arith.constant 0 : index
      %19 = vector.load %arg5[%c0_15, %c0_16] : memref<512x128xbf16, #tpu.memory_space<vmem>>, vector<512x128xbf16>
      %cst_17 = arith.constant dense<0.000000e+00> : vector<8x128xf32>
      %20 = tpu.matmul %18, %19, %cst_17 {dimension_numbers = #tpu.dot_dimension_numbers<[1], [0], [0], [1], [0, 0, 1, 1], [], []>} : vector<8x512xbf16>, vector<512x128xbf16>, vector<8x128xf32> -> vector<8x128xf32>
      %c0_18 = arith.constant 0 : index
      %c0_19 = arith.constant 0 : index
      %21 = vector.load %arg6[%c0_18, %c0_19] : memref<1x128xf32, #tpu.memory_space<vmem>>, vector<1x128xf32>
      %22 = vector.broadcast %21 : vector<1x128xf32> to vector<8x128xf32>
      %23 = arith.addf %20, %22 : vector<8x128xf32>
      %cst_20 = arith.constant 0.000000e+00 : f32
      %24 = vector.broadcast %cst_20 : f32 to vector<8x128xf32>
      %25 = arith.maximumf %23, %24 : vector<8x128xf32>
      %26 = arith.truncf %25 : vector<8x128xf32> to vector<8x128xbf16>
      %c0_21 = arith.constant 0 : index
      %c0_22 = arith.constant 0 : index
      %27 = vector.load %arg7[%c0_21, %c0_22] : memref<128x128xbf16, #tpu.memory_space<vmem>>, vector<128x128xbf16>
      %cst_23 = arith.constant dense<0.000000e+00> : vector<8x128xf32>
      %28 = tpu.matmul %26, %27, %cst_23 {dimension_numbers = #tpu.dot_dimension_numbers<[1], [0], [0], [1], [0, 0, 1, 1], [], []>} : vector<8x128xbf16>, vector<128x128xbf16>, vector<8x128xf32> -> vector<8x128xf32>
      %c0_24 = arith.constant 0 : index
      %c0_25 = arith.constant 0 : index
      %29 = vector.load %arg8[%c0_24, %c0_25] : memref<1x128xf32, #tpu.memory_space<vmem>>, vector<1x128xf32>
      %30 = vector.broadcast %29 : vector<1x128xf32> to vector<8x128xf32>
      %31 = arith.addf %28, %30 : vector<8x128xf32>
      %32 = arith.truncf %31 : vector<8x128xf32> to vector<8x128xbf16>
      %c0_26 = arith.constant 0 : index
      %c0_27 = arith.constant 0 : index
      %33 = vector.load %arg9[%c0_26, %c0_27] : memref<8x128xbf16, #tpu.memory_space<vmem>>, vector<8x128xbf16>
      tpu.vector_store %arg9[%c0_26, %c0_27], %32 {strides = array<i32>} : memref<8x128xbf16, #tpu.memory_space<vmem>>, vector<8x128xbf16>,
    } else {
    }
    return
  }
  func.func @transform_0(%arg0: i32, %arg1: i32) -> (i32, i32) {
    %c0_i32 = arith.constant 0 : i32
    return %arg0, %arg1 : i32, i32
  }
  func.func @transform_1(%arg0: i32, %arg1: i32) -> (i32, i32) {
    %c0_i32 = arith.constant 0 : i32
    %c0_i32_0 = arith.constant 0 : i32
    %c0_i32_1 = arith.constant 0 : i32
    return %c0_i32, %c0_i32_0 : i32, i32
  }
  func.func @transform_2(%arg0: i32, %arg1: i32) -> (i32, i32) {
    %c0_i32 = arith.constant 0 : i32
    %c0_i32_0 = arith.constant 0 : i32
    %c0_i32_1 = arith.constant 0 : i32
    return %c0_i32, %c0_i32_0 : i32, i32
  }
  func.func @transform_3(%arg0: i32, %arg1: i32) -> (i32, i32) {
    %c0_i32 = arith.constant 0 : i32
    %c0_i32_0 = arith.constant 0 : i32
    %c0_i32_1 = arith.constant 0 : i32
    return %c0_i32, %c0_i32_0 : i32, i32
  }
  func.func @transform_4(%arg0: i32, %arg1: i32) -> (i32, i32) {
    %c0_i32 = arith.constant 0 : i32
    %c0_i32_0 = arith.constant 0 : i32
    %c0_i32_1 = arith.constant 0 : i32
    return %c0_i32, %c0_i32_0 : i32, i32
  }
  func.func @transform_5(%arg0: i32, %arg1: i32) -> (i32, i32) {
    %c0_i32 = arith.constant 0 : i32
    %c0_i32_0 = arith.constant 0 : i32
    %c0_i32_1 = arith.constant 0 : i32
    return %c0_i32, %c0_i32_0 : i32, i32
  }
  func.func @transform_6(%arg0: i32, %arg1: i32) -> (i32, i32) {
    %c0_i32 = arith.constant 0 : i32
    %c0_i32_0 = arith.constant 0 : i32
    %c0_i32_1 = arith.constant 0 : i32
    return %c0_i32, %c0_i32_0 : i32, i32
  }
  func.func @transform_7(%arg0: i32, %arg1: i32) -> (i32, i32) {
    %c0_i32 = arith.constant 0 : i32
    %c0_i32_0 = arith.constant 0 : i32
    return %arg0, %c0_i32 : i32, i32
  }
}

</mosaic_0001>

<bundles_post_ra>
// kernel: tpu_custom_call.1
= control target key start
LH: loop header
LB: loop body
LE: loop exit
PB: predicated region body
PF: predicated region fallthrough
CT: control target
= control target key end

     0   :  { %s1907_s0 = inlined_call_operand.hbm [shape: bf16[16,32], index: 0, kind: input, shape index: {}]   ;;  %s1908_s1 = inlined_call_operand.hbm [shape: bf16[32,512], index: 1, kind: input, shape index: {}]   ;;  %s1909_s2 = inlined_call_operand.hbm [shape: f32[1,512], index: 2, kind: input, shape index: {}]   ;;  %s1910_s3 = inlined_call_operand.hbm [shape: bf16[512,128], index: 3, kind: input, shape index: {}]   ;;  %s1911_s4 = inlined_call_operand.vmem [shape: f32[1,128], index: 4, kind: input, shape index: {}]   ;;  %s1912_s5 = inlined_call_operand.hbm [shape: bf16[128,128], index: 5, kind: input, shape index: {}]   ;;  %s1913_s6 = inlined_call_operand.vmem [shape: f32[1,128], index: 6, kind: input, shape index: {}]   ;;  %s1914_s7 = inlined_call_operand.hbm [shape: bf16[16,128], index: 7, kind: output, shape index: {}]  }
   0x1   :  { %1915 = sst [smem:[#allocation17_spill]] %s1908_s1 }
   0x2   :  { %12 = vsyncpa [#allocation4], 0 }
   0x3   :  { %14 = vsyncpa [#allocation4 + $0x1], 0 }
   0x4   :  { %15 = vsyncpa [#allocation7], 0 }
   0x5   :  { %16 = vsyncpa [#allocation10], 0 }
   0x6   :  { %17 = vsyncpa [#allocation5], 0 }
   0x7   :  { %19 = vsyncpa [#allocation5 + $0x1], 0  ;;  %s1724_s24 = smov 0   ;;  %s1726_s25 = smov 0  }
   0x8   :  { %s1728_s26 = smov 0   ;;  %s1730_s27 = smov 0  }
   0x9   :  { %s1732_s28 = smov 0   ;;  %s1734_s29 = smov 0  }
   0xa LB: > { %s1060_s30 = sadd.s32 4294967295, %s1674_s29   ;;  %p1062_p0 = scmp.ge.s32.totalorder %s1674_s29, 1  ;;  %s1674_s29 = sphi %s1734_s29, %s25_s29   ;;  %s1670_s28 = sphi %s1732_s28, %s1927_s28   ;;  %s1666_s27 = sphi %s1730_s27, %s1926_s27   ;;  %s1662_s26 = sphi %s1728_s26, %s1925_s26   ;;  %s1658_s25 = sphi %s1726_s25, %s1924_s25   ;;  %s1654_s24 = sphi %s1724_s24, %s1923_s24  }
   0xb   : > { %p1758_p1 = scmp.eq.s32.totalorder %s1060_s30, 0  ;;  %p222_p2 = scmp.lt.s32.totalorder %s1674_s29, 3 }
   0xc   : > { %s1917_s1 = sld [smem:[#allocation17_spill]]  ;;  %s1676_s13 = smov [#allocation6]  }
   0xd   : > { %p1766_p3 = pnand %p1062_p0, %p222_p2  ;;  %s235_s14 = sshll.u32 %s1676_s13, 4  ;;  %s236_s14 = int_to_ptr.vmem [resolvable:$true] %s235_s14 }
   0xe   : > { %p1067_p6 = scmp.ge.s32.totalorder %s1674_s29, 2  ;;  %s259_s18 = sshll.u32 %s1910_s3, 4  ;;  %s260_s18 = int_to_ptr.hbm [resolvable:$true] %s259_s18 }
   0xf   : > { %p1345_p4 = pneg %p1766_p3  ;;  %s1677_s19 = smov 256  }
  0x10   : > { %s1678_s20 = smov 16   ;;  %s1679_s21 = smov [#allocation9]  }
  0x11   : > { %p1774_p5 = pnand %p1345_p4, %p1758_p1  ;;  %s261_s22 = sshll.u32 %s1679_s21, 4  ;;  %s262_s22 = int_to_ptr.vmem [resolvable:$true] %s261_s22 }
  0x12   : > { %s233_s11 = sshll.u32 %s1917_s1, 4  ;;  %s1680_s23 = smov 64   ;;  %s234_s11 = int_to_ptr.hbm [resolvable:$true] %s233_s11 }
  0x13   : > { %1348 = dma.hbm_to_vmem [thread:$0]  (!%p1774_p5), %s234_s11, 1024, %s236_s14, [#allocation7], %s1677_s19, %s1677_s19, %s1678_s20  }
  0x14   : > { %s1681_s9 = smov 4   ;;  %s248_s16 = sshll.u32 %s1909_s2, 4  ;;  %s249_s16 = int_to_ptr.hbm [resolvable:$true] %s248_s16 }
  0x15   : > { %1354 = dma.hbm_to_vmem [thread:$0]  (!%p1774_p5), %s260_s18, 4096, %s262_s22, [#allocation10], %s1680_s23, %s1680_s23, %s1681_s9  }
  0x16   : > { %s1682_s17 = smov [#allocation8]   ;;  %s276_s20 = sshll.u32 %s1912_s5, 4  ;;  %s277_s20 = int_to_ptr.hbm [resolvable:$true] %s276_s20 }
  0x17   : > { %s250_s11 = sshll.u32 %s1682_s17, 4  ;;  %s1683_s18 = smov [#allocation11]   ;;  %s251_s11 = int_to_ptr.vmem [resolvable:$true] %s250_s11 }
  0x18   : > { %1351 = dma.hbm_to_vmem [thread:$0]  (!%p1774_p5), %s249_s16, 64, %s251_s11, [#allocation7]  }
  0x19   : > { %s278_s21 = sshll.u32 %s1683_s18, 4  ;;  %s37_s22 = sadd.s32 1, %s1670_s28  ;;  %s279_s21 = int_to_ptr.vmem [resolvable:$true] %s278_s21 }
  0x1a   : > { %1357 = dma.hbm_to_vmem [thread:$0]  (!%p1774_p5), %s277_s20, 1024, %s279_s21, [#allocation10], %s1680_s23, %s1680_s23, %s1681_s9  }
  0x1b   : > { %s1061_s10 = sadd.s32 4294967294, %s1674_s29   ;;  %p39_p7 = scmp.ge.s32.totalorder %s37_s22, 2 }
  0x1c   : > { %s46_s13 = sadd.s32 1, %s1662_s26  ;;  %p53_p8 = scmp.ne.s32.totalorder %s1662_s26, %s1658_s25 }
  0x1d   : > { %s1929_s22 = smov (%p39_p7, %s37_s22), 0  ;;  %p54_p9 = scmp.eq.s32.totalorder %s1674_s29, 0 }
  0x1e   : > { %p59_p10 = scmp.ne.s32.totalorder %s1658_s25, %s1654_s24  ;;  %s41_s16 = ssub.s32 %s1670_s28, %s1929_s22 }
  0x1f   : > { %p209_p11 = scmp.eq.s32.totalorder %s1060_s30, 1  ;;  %p44_p12 = scmp.eq.s32.totalorder %s41_s16, 0 }
  0x20   : > { %p1812_p13 = por %p1758_p1, %p59_p10  ;;  %p215_p2 = scmp.eq.s32.totalorder %s1061_s10, 1 }
  0x21   : > { %p1816_p0 = por %p209_p11, %p53_p8  ;;  %p55_p4 = por %p54_p9, %p53_p8 }
  0x22   : > { %s1821_s9 = scalar_select %p44_p12, %s1662_s26, %s46_s13  }
  0x23   : > { %p1823_p5 = por %p215_p2, %p59_p10  ;;  %s295_s11 = sand.u32 1, %s1662_s26  }
  0x24   : > { %s1069_s30 = sshll.u32 %s1670_s28, 2  ;;  %p1370_p7 = scmp.lt.s32.totalorder %s1674_s29, 2 }
  0x25   : > { %s1068_s14 = sshll.u32 %s295_s11, 2  ;;  %s304_s18 = scalar_lea.hbm %s1907_s0, %s1069_s30 }
  0x26   : > { %s306_s21 = sshll.u32 %s304_s18, 4  ;;  %s299_s16 = scalar_lea.vmem [#allocation3], %s1068_s14  ;;  %s307_s21 = int_to_ptr.hbm [resolvable:$true] %s306_s21 }
  0x27   : > { %s308_s1 = sshll.u32 %s299_s16, 4  ;;  %p1359_p11 = pnand %p1370_p7, %p55_p4  ;;  %s309_s1 = int_to_ptr.vmem [resolvable:$true] %s308_s1 }
  0x28   : > { %s296_s10 = scalar_lea.sflag [#allocation4], %s295_s11  ;;  %317 = sbr.rel (%p1766_p3) target bundleno = 478 (0x1de), region = 48 }
  0x29   : > { %1361 = dma.hbm_to_vmem [thread:$0]  (!%p1359_p11), %s307_s21, 64, %s309_s1, %s296_s10  }
  0x2a   : > { %s1836_s13 = sand.u32 (!%p1766_p3), 1, %s1658_s25  }
  0x2b   : > { %s1071_s19 = sshll.u32 (!%p1766_p3), %s1836_s13, 2  ;;  %s320_s30 = scalar_lea.sflag (!%p1766_p3), [#allocation4], %s1836_s13 }
  0x2c   : > { %s1842_s14 = scalar_lea.vmem (!%p1766_p3), [#allocation3], %s1071_s19 }
  0x2d   : > { %1637 = dma.done.wait (%p1812_p13), %s320_s30, 64  }
  0x2e   : > { %1639 = vsyncadd (%p1812_p13), %s320_s30, 4294967232 }
  0x2f   : > { %1641 = dma.done.wait (%p1758_p1), [#allocation7], 1088  }
  0x30   : > { %1643 = vsyncadd (%p1758_p1), [#allocation7], 4294966208 }
  0x31   : > { %1645 = dma.done.wait (%p1758_p1), [#allocation10], 5120  }
  0x32   : > { %1647 = vsyncadd (%p1758_p1), [#allocation10], 4294962176  ;;  %v1095_v0 = vld [vmem:[#allocation6 + $0x20] sm:$0xf]  ;;  %v1283_v1 = vld [vmem:[#allocation6 + $0x2c] sm:$0xf0] }
  0x33   : > { %v1103_v2 = vld [vmem:[#allocation6 + $0x28] sm:$0xf]  ;;  %v1096_v3 = vor.u32 %v1283_v1, %v1095_v0  ;;  %v1284_v4 = vld [vmem:[#allocation6 + $0x34] sm:$0xf0]  ;;  %v1282_v5 = vld [vmem:[#allocation6 + $0x2c] sm:$0xf] }
  0x34   : > { %v1105_v6 = vld [vmem:[#allocation6 + $0x38] sm:$0xf0]  ;;  %v1104_v7 = vor.u32 %v1284_v4, %v1103_v2  ;;  %v1079_v9 = vld [vmem:[#allocation6] sm:$0xf]  ;;  %v1279_v10 = vld [vmem:[#allocation6 + $0xc] sm:$0xf0] }
  0x35   : > { %v1108_v8 = vor.u32 %v1282_v5, %v1105_v6  ;;  %v1087_v11 = vld [vmem:[#allocation6 + $0x8] sm:$0xf]  ;;  %447 = vmatpush.bf16.msra.mxu1 %v1096_v3  ;;  %v1080_v12 = vor.u32 %v1279_v10, %v1079_v9  ;;  %v1280_v13 = vld [vmem:[#allocation6 + $0x14] sm:$0xf0]  ;;  %v1278_v14 = vld [vmem:[#allocation6 + $0xc] sm:$0xf] }
  0x36   : > { %v1089_v15 = vld [vmem:[#allocation6 + $0x18] sm:$0xf0]  ;;  %473 = vmatpush.bf16.msra.mxu2 %v1104_v7  ;;  %v1088_v16 = vor.u32 %v1280_v13, %v1087_v11  ;;  %v1281_v18 = vld [vmem:[#allocation6 + $0x24] sm:$0xf]  ;;  %v1097_v19 = vld [vmem:[#allocation6 + $0x30] sm:$0xf0] }
  0x37   : > { %486 = vmatpush.bf16.msra.mxu3 %v1108_v8  ;;  %v1092_v17 = vor.u32 %v1278_v14, %v1089_v15  ;;  %v1100_v20 = vor.u32 %v1281_v18, %v1097_v19  ;;  %v1277_v21 = vld [vmem:[#allocation6 + $0x4] sm:$0xf]  ;;  %v1292_v22 = vld [vmem:[#allocation9 + $0x38] sm:$0xff]  ;;  %v1081_v23 = vld [vmem:[#allocation6 + $0x10] sm:$0xf0]  ;;  %vm437_vm0 = vcmask 261120  }
  0x38   : > { %v1308_v24 = vld [vmem:[#allocation9 + $0xb8] sm:$0xff]  ;;  %790 = vmatpush.bf16.msra.mxu0 %v1292_v22  ;;  %v1291_v27 = vld [vmem:[#allocation9 + $0x30] sm:$0xff]  ;;  %v1084_v28 = vor.u32 %v1277_v21, %v1081_v23  ;;  %v1290_v32 = vld [vmem:[#allocation9 + $0x28] sm:$0xff]  ;;  %s1274_s12 = sshll.u32 %s1666_s27, 2  ;;  %s374_s16 = scalar_lea.vmem [#allocation12], %s1071_s19 }
  0x39   : > { %v1316_v25 = vld [vmem:[#allocation9 + $0xf8] sm:$0xff]  ;;  %448 = vmatpush.bf16.msra.mxu1 %v1080_v12  ;;  %v1307_v29 = vld [vmem:[#allocation9 + $0xb0] sm:$0xff]  ;;  %v1306_v33 = vld [vmem:[#allocation9 + $0xa8] sm:$0xff]  ;;  %s938_s21 = scalar_lea.hbm %s1914_s7, %s1274_s12  ;;  %s940_s10 = sshll.u32 %s374_s16, 4  ;;  %s941_s10 = int_to_ptr.vmem [resolvable:$true] %s940_s10 }
  0x3a   : > { %v388_v26 = vld [vmem:[%s1842_s14] sm:$0xf]  ;;  %474 = vmatpush.bf16.msra.mxu2 %v1088_v16  ;;  %v1314_v34 = vld [vmem:[#allocation9 + $0xe8] sm:$0xff]  ;;  %v1289_v36 = vld [vmem:[#allocation9 + $0x20] sm:$0xff]  ;;  %s942_s30 = sshll.u32 %s938_s21, 4  ;;  %s928_s27 = scalar_lea.sflag [#allocation5], %s1836_s13  ;;  %s943_s30 = int_to_ptr.hbm [resolvable:$true] %s942_s30 }
  0x3b   : > { %487 = vmatpush.bf16.msra.mxu3 %v1092_v17  ;;  %v1315_v30 = vld [vmem:[#allocation9 + $0xf0] sm:$0xff]  ;;  %v1300_v31 = vld [vmem:[#allocation9 + $0x78] sm:$0xff]  ;;  %v1305_v37 = vld [vmem:[#allocation9 + $0xa0] sm:$0xff]  ;;  %s1598_s14 = sshra.s32 %s943_s30, 4  ;;  %s1604_s15 = scalar_lea.hbm %s1914_s7, 8  ;;  %s1599_s14 = int_to_ptr.hbm [resolvable:$true] %s1598_s14 }
  0x3c   : > { %1109 = vmatmul.msk.bf16.vlgmr.msra.gmra.mxu1 %vm437_vm0, %v388_v26  ;;  %791 = vmatpush.bf16.msra.mxu0 %v1291_v27  ;;  %v1299_v35 = vld [vmem:[#allocation9 + $0x70] sm:$0xff]  ;;  %v1313_v38 = vld [vmem:[#allocation9 + $0xe0] sm:$0xff]  ;;  %v1288_v39 = vld [vmem:[#allocation9 + $0x18] sm:$0xff]  ;;  %s1600_s1 = scalar_lea.hbm %s1599_s14, 4  ;;  %p1605_p9 = scmp.lt.s32.totalorder %s1599_s14, %s1914_s7 }
  0x3d   : > { %460 = vmatpush.bf16.msrb.mxu1 %v1100_v20  ;;  %1111 = vmatmul.msk.bf16.vlgmr.msra.gmra.mxu2 %vm437_vm0, %v388_v26  ;;  %v1304_v40 = vld [vmem:[#allocation9 + $0x98] sm:$0xff]  ;;  %v1287_v42 = vld [vmem:[#allocation9 + $0x10] sm:$0xff]  ;;  %v1286_v43 = vld [vmem:[#allocation9 + $0x8] sm:$0xff]  ;;  %p1601_p1 = scmp.ne.s32.totalorder %s1599_s14, %s1600_s1  ;;  %p1606_p10 = scmp.lt.s32.totalorder %s1604_s15, %s1600_s1 }
  0x3e   : > { %816 = vmatpush.bf16.msrb.mxu2 %v1308_v24  ;;  %1112 = vmatmul.msk.bf16.vlgmr.msra.gmra.mxu3 %vm437_vm0, %v388_v26  ;;  %v1312_v41 = vld [vmem:[#allocation9 + $0xd8] sm:$0xff]  ;;  %v1298_v44 = vld [vmem:[#allocation9 + $0x68] sm:$0xff]  ;;  %v1303_v45 = vld [vmem:[#allocation9 + $0x90] sm:$0xff] }
  0x3f   : > { %829 = vmatpush.bf16.msrb.mxu3 %v1316_v25  ;;  %v1311_v46 = vld [vmem:[#allocation9 + $0xd0] sm:$0xff]  ;;  %v1285_v47 = vld [vmem:[#allocation9] sm:$0xff]  ;;  %v1302_v49 = vld [vmem:[#allocation9 + $0x88] sm:$0xff]  ;;  %p1602_p3 = pnand %p1601_p1, %p1816_p0  ;;  %p1607_p12 = por %p1606_p10, %p1605_p9 }
  0x40   : > { %792 = vmatpush.bf16.msra.mxu0 %v1290_v32  ;;  %v1297_v48 = vld [vmem:[#allocation9 + $0x60] sm:$0xff]  ;;  %v1310_v50 = vld [vmem:[#allocation9 + $0xc8] sm:$0xff]  ;;  %v1296_v51 = vld [vmem:[#allocation9 + $0x58] sm:$0xff] }
  0x41   : > { %461 = vmatpush.bf16.msrb.mxu1 %v1084_v28  ;;  %v1301_v52 = vld [vmem:[#allocation9 + $0x80] sm:$0xff]  ;;  %v1295_v54 = vld [vmem:[#allocation9 + $0x50] sm:$0xff]  ;;  %v1294_v55 = vld [vmem:[#allocation9 + $0x48] sm:$0xff]  ;;  %p1603_p8 = pneg %p1602_p3 }
  0x42   : > { %817 = vmatpush.bf16.msrb.mxu2 %v1307_v29  ;;  %v1309_v53 = vld [vmem:[#allocation9 + $0xc0] sm:$0xff]  ;;  %v1324_v57 = vld [vmem:[#allocation11 + $0x38] sm:$0xff]  ;;  %v1323_v19 = vld [vmem:[#allocation11 + $0x30] sm:$0xff] }
  0x43   : > { %830 = vmatpush.bf16.msrb.mxu3 %v1315_v30  ;;  %v1293_v56 = vld [vmem:[#allocation9 + $0x40] sm:$0xff]  ;;  %v508_v58 = vld [vmem:[#allocation8] sm:$0xf]  ;;  %v1322_v20 = vld [vmem:[#allocation11 + $0x28] sm:$0xff]  ;;  %p1608_p13 = pnand %p1607_p12, %p1603_p8 }
  0x44   : > { %793 = vmatpush.bf16.msra.mxu0 %v1289_v36  ;;  %v510_v59 = vperm.slane %v508_v58, 0  ;;  %v512_v63 = vperm.slane %v508_v58, 2  ;;  %v513_v0 = vperm.slane %v508_v58, 3  ;;  %v511_v11 = vperm.slane %v508_v58, 1  ;;  %v1321_v21 = vld [vmem:[#allocation11 + $0x20] sm:$0xff]  ;;  %v1320_v22 = vld [vmem:[#allocation11 + $0x18] sm:$0xff] }
  0x45   : > { %803 = vmatpush.bf16.msra.mxu1 %v1300_v31  ;;  %v1319_v23 = vld [vmem:[#allocation11 + $0x10] sm:$0xff]  ;;  %v1318_v24 = vld [vmem:[#allocation11 + $0x8] sm:$0xff]  ;;  %v1317_v25 = vld [vmem:[#allocation11] sm:$0xff] }
  0x46   : > { %818 = vmatpush.bf16.msrb.mxu2 %v1306_v33  ;;  %v1432_v28 = vld [vmem:[%s1911_s4] ss:$0 sm:$0xff] }
  0x47   : > { %831 = vmatpush.bf16.msrb.mxu3 %v1314_v34 }
  0x48   : > { %794 = vmatpush.bf16.msra.mxu0 %v1288_v39 }
  0x49   : > { %804 = vmatpush.bf16.msra.mxu1 %v1299_v35 }
  0x4a   : > { %819 = vmatpush.bf16.msrb.mxu2 %v1305_v37 }
  0x4b   : > { %832 = vmatpush.bf16.msrb.mxu3 %v1313_v38 }
  0x4c   : > { %1110 = vmatmul.msk.bf16.vlgmr.msrb.gmra.mxu1 %vm437_vm0, %v388_v26  ;;  %795 = vmatpush.bf16.msra.mxu0 %v1287_v42 }
  0x4d   : > { %805 = vmatpush.bf16.msra.mxu1 %v1298_v44 }
  0x4e   : > { %820 = vmatpush.bf16.msrb.mxu2 %v1304_v40 }
  0x4f   : > { %833 = vmatpush.bf16.msrb.mxu3 %v1312_v41  ;;  %v1433_v41 = vld [vmem:[%s1913_s6] ss:$0 sm:$0xff] }
  0x50   : > { %796 = vmatpush.bf16.msra.mxu0 %v1286_v43 }
  0x51   : > { %806 = vmatpush.bf16.msra.mxu1 %v1297_v48 }
  0x52   : > { %821 = vmatpush.bf16.msrb.mxu2 %v1303_v45 }
  0x53   : > { %834 = vmatpush.bf16.msrb.mxu3 %v1311_v46 }
  0x54   : > { %797 = vmatpush.bf16.msra.mxu0 %v1285_v47 }
  0x55   : > { %807 = vmatpush.bf16.msra.mxu1 %v1296_v51 }
  0x56   : > { %822 = vmatpush.bf16.msrb.mxu2 %v1302_v49 }
  0x57   : > { %835 = vmatpush.bf16.msrb.mxu3 %v1310_v50 }
  0x58   : > { %912 = vmatpush.bf16.msrb.mxu0 %v1324_v57 }
  0x59   : > { %808 = vmatpush.bf16.msra.mxu1 %v1295_v54 }
  0x5a   : > { %823 = vmatpush.bf16.msrb.mxu2 %v1301_v52 }
  0x5b   : > { %836 = vmatpush.bf16.msrb.mxu3 %v1309_v53 }
  0x5c   : > { %913 = vmatpush.bf16.msrb.mxu0 %v1323_v19 }
  0x5d   : > { %809 = vmatpush.bf16.msra.mxu1 %v1294_v55 }
  0x60   : > { %914 = vmatpush.bf16.msrb.mxu0 %v1322_v20 }
  0x61   : > { %810 = vmatpush.bf16.msra.mxu1 %v1293_v56 }
  0x64   : > { %915 = vmatpush.bf16.msrb.mxu0 %v1321_v21 }
  0x68   : > { %916 = vmatpush.bf16.msrb.mxu0 %v1320_v22 }
  0x6c   : > { %917 = vmatpush.bf16.msrb.mxu0 %v1319_v23 }
  0x70   : > { %918 = vmatpush.bf16.msrb.mxu0 %v1318_v24 }
  0x74   : > { %919 = vmatpush.bf16.msrb.mxu0 %v1317_v25 }
  0xb9   : > { %v450_v60 = vpop.f32.mrf.mxu1 }
  0xba   : > { %v518_v61 = vadd.f32 %v510_v59, %v450_v60 }
  0xbc   : > { %v522_v62 = vmax.f32 %v518_v61, 0.0 }
  0xbe   : > { %v526_v1 = vpack.c.bf16 %v522_v62, %v522_v62 }
  0xc0   : > { %v476_v2 = vpop.f32.mrf.mxu2  ;;  %798 = vmatmul.bf16.vlgmr.msra.gmra.mxu0 %v526_v1 }
  0xc1   : > { %v489_v3 = vpop.f32.mrf.mxu3  ;;  %v520_v4 = vadd.f32 %v512_v63, %v476_v2  ;;  %v452_v6 = vpop.f32.mrf.mxu1 }
  0xc2   : > { %v521_v5 = vadd.f32 %v513_v0, %v489_v3 }
  0xc3   : > { %v524_v7 = vmax.f32 %v520_v4, 0.0 }
  0xc4   : > { %v525_v8 = vmax.f32 %v521_v5, 0.0 }
  0xc5   : > { %v528_v9 = vpack.c.bf16 %v524_v7, %v524_v7 }
  0xc6   : > { %v529_v10 = vpack.c.bf16 %v525_v8, %v525_v8 }
  0xc7   : > { %824 = vmatmul.bf16.vlgmr.msrb.gmra.mxu2 %v528_v9 }
  0xc8   : > { %837 = vmatmul.bf16.vlgmr.msrb.gmra.mxu3 %v529_v10  ;;  %v478_v12 = vpop.f32.mrf.mxu2 }
  0xc9   : > { %v491_v13 = vpop.f32.mrf.mxu3  ;;  %v463_v14 = vpop.f32.mrf.mxu1 }
  0xca   : > { %v519_v15 = vadd.f32 %v511_v11, %v463_v14 }
  0xcc   : > { %v523_v16 = vmax.f32 %v519_v15, 0.0 }
  0xce   : > { %v527_v17 = vpack.c.bf16 %v523_v16, %v523_v16 }
  0xd0   : > { %811 = vmatmul.bf16.vlgmr.msra.gmra.mxu1 %v527_v17 }
  0xd1   : > { %v465_v18 = vpop.f32.mrf.mxu1 }
 0x13d   : > { %v799_v26 = vpop.f32.mrf.mxu0 }
 0x13e   : > { %v800_v31 = vadd.f32 %v1432_v28, %v799_v26 }
 0x145   : > { %v801_v27 = vpop.f32.mrf.mxu0 }
 0x14a   : > { %v825_v29 = vpop.f32.mrf.mxu2 }
 0x14b   : > { %v838_v30 = vpop.f32.mrf.mxu3 }
 0x14d   : > { %v812_v32 = vpop.f32.mrf.mxu1 }
 0x14e   : > { %v813_v33 = vadd.f32 %v812_v32, %v800_v31 }
 0x150   : > { %v826_v34 = vadd.f32 %v825_v29, %v813_v33 }
 0x152   : > { %v839_v35 = vadd.f32 %v838_v30, %v826_v34  ;;  %v827_v36 = vpop.f32.mrf.mxu2 }
 0x153   : > { %v840_v37 = vpop.f32.mrf.mxu3 }
 0x154   : > { %v842_v38 = vmax.f32 %v839_v35, 0.0 }
 0x155   : > { %v814_v39 = vpop.f32.mrf.mxu1 }
 0x156   : > { %v843_v40 = vpack.c.bf16 %v842_v38, %v842_v38 }
 0x158   : > { %920 = vmatmul.bf16.vlgmr.msrb.gmra.mxu0 %v843_v40 }
 0x1d5   : > { %v921_v42 = vpop.f32.mrf.mxu0 }
 0x1d6   : > { %v922_v43 = vadd.f32 %v1433_v41, %v921_v42 }
 0x1d8   : > { %v925_v44 = vpack.c.bf16 %v922_v43, %v922_v43 }
 0x1da   : > { %926 = vst [vmem:[%s374_s16] sm:$0xf] %v925_v44 }
 0x1db   : > { %1611 = shalt.err (!%p1608_p13)
}
 0x1dc   : > { %1343 = dma.vmem_to_hbm [thread:$0]  (%p1816_p0), %s941_s10, 64, %s943_s30, %s928_s27  }
 0x1dd   : > { %v923_v45 = vpop.f32.mrf.mxu0 }
 0x1de PF: > { %s954_s13 = sand.u32 1, %s1654_s24   ;;  %p1363_p2 = pnand %p1067_p6, %p1823_p5 }
 0x1df   : > { %s955_s20 = scalar_lea.sflag [#allocation5], %s954_s13 }
 0x1e0   : > { %p1364_p4 = pneg %p1363_p2 }
 0x1e2   : > { %1649 = dma.done.wait (%p1364_p4), %s955_s20, 64  }
 0x1e3   : > { %1651 = vsyncadd (%p1364_p4), %s955_s20, 4294967232  ;;  %s25_s29 = sadd.s32 1, %s1674_s29   ;;  %s1923_s24 = smov %s1658_s25 }
 0x1e4   : > { %p22_p7 = scmp.ge.s32.totalorder %s25_s29, 4   ;;  %s1924_s25 = smov %s1662_s26 }
 0x1e5   : > { %s1925_s26 = smov %s1821_s9  ;;  %s1926_s27 = smov %s1670_s28 }
 0x1e6   : > { %s1927_s28 = smov %s1929_s22  ;;  %24 = sbr.rel (!%p22_p7) target bundleno = 10 (0xa), region = 117 }
 0x1eb   :  { %961 = vsyncpa [#allocation4], 1 }
 0x1ec   :  { %963 = vsyncpa [#allocation4 + $0x1], 1 }
 0x1ed   :  { %964 = vsyncpa [#allocation7], 1 }
 0x1ee   :  { %965 = vsyncpa [#allocation10], 1 }
 0x1ef   :  { %966 = vsyncpa [#allocation5], 1 }
 0x1f0   :  { %968 = vsyncpa [#allocation5 + $0x1], 1 }

</bundles_post_ra>
